<compile_context>
chip_gen: v5e
topology: v5e:2x2
jax: 0.10.0
libtpu: 0.0.40
codegen_flags: <defaults>
</compile_context>

<pallas_src>
import math

import jax
import jax.numpy as jnp
from jax.experimental import pallas as pl
from jax.experimental.pallas import tpu as pltpu

_NEG_BIG = -1e30  # plain Python float: kernel bodies must not capture jax.Array constants


def _make_kernel(n: int, tm: int, tpc: int, has_partial: bool, diag_mode: str):
    """Build the kernel body, specialized at trace time for the tiling configuration."""

    def kernel(tau_ref, s_ref, m_ref, l_ref, rl_ref, dg_ref):
        # refs: tau (1,1) SMEM; s (TM, N) slab; outputs (per core, resident across i):
        #   m_ref, l_ref : (1, N)  running column max / sum-exp
        #   rl_ref       : (TM, 1) accumulated row-LSE values (summed in the epilogue)
        #   dg_ref       : (TM, 1) accumulated diagonal values
        c = pl.program_id(0)
        i = pl.program_id(1)
        tau = tau_ref[0, 0]

        @pl.when(i == 0)
        def _init():
            m_ref[...] = jnp.full((1, n), _NEG_BIG, jnp.float32)
            l_ref[...] = jnp.zeros((1, n), jnp.float32)
            rl_ref[...] = jnp.zeros((tm, 1), jnp.float32)
            dg_ref[...] = jnp.zeros((tm, 1), jnp.float32)

        # Logical (unclamped) first row of this slab; the input index_map clamps the block
        # index so a duplicated slab re-reads the last real slab (fully masked below).
        row_start = (c * tpc + i) * tm
        s = s_ref[...].astype(jnp.float32) * tau            # (TM, N) f32

        def fast_path():
            # All TM rows are valid: no masking, no full-width iotas.
            # ---- diagonal from the (TM, TM) diagonal block only ----
            if diag_mode == "full":                         # tm == n (single slab)
                blk = s
            elif diag_mode == "slice":                      # tm % 128 == 0 -> aligned slice
                start = pl.multiple_of(row_start, tm)
                blk = s_ref[:, pl.ds(start, tm)].astype(jnp.float32) * tau
            else:                                           # rare fallback (tm < 128)
                blk = None
            if blk is not None:
                r_loc = jax.lax.broadcasted_iota(jnp.int32, blk.shape, 0)
                c_loc = jax.lax.broadcasted_iota(jnp.int32, blk.shape, 1)
                diag_rows = jnp.sum(jnp.where(r_loc == c_loc, blk, 0.0),
                                    axis=1, keepdims=True)
            else:
                r_g = jax.lax.broadcasted_iota(jnp.int32, (tm, n), 0) + row_start
                c_g = jax.lax.broadcasted_iota(jnp.int32, (tm, n), 1)
                diag_rows = jnp.sum(jnp.where(r_g == c_g, s, 0.0), axis=1, keepdims=True)

            # ---- single exp pass: online column LSE + row LSE partial ----
            m_old = m_ref[...]                                          # (1, N)
            m_new = jnp.maximum(m_old, jnp.max(s, axis=0, keepdims=True))
            e = jnp.exp(s - m_new)                                      # the one (TM,N) exp
            l_ref[...] = l_ref[...] * jnp.exp(m_old - m_new) + jnp.sum(
                e, axis=0, keepdims=True)
            m_ref[...] = m_new
            c_shift = jnp.max(m_new, axis=1, keepdims=True)             # (1,1), >= all s here
            w = jnp.exp(m_new - c_shift)                                # (1,N), <= 1
            row_sum = jnp.sum(e * w, axis=1, keepdims=True)             # sum_j exp(s_ij - c)
            rl_ref[...] += jnp.log(row_sum) + c_shift
            dg_ref[...] += diag_rows

        def masked_path():
            # Partial (or fully padded duplicated) slab: runs at most once per core.
            r_g = jax.lax.broadcasted_iota(jnp.int32, (tm, n), 0) + row_start
            c_g = jax.lax.broadcasted_iota(jnp.int32, (tm, n), 1)
            valid = r_g < n                                             # (TM, N)
            rv1 = valid[:, 0:1]                                         # (TM, 1)
            s_safe = jnp.where(valid, s, _NEG_BIG)

            diag_rows = jnp.sum(jnp.where(r_g == c_g, s, 0.0), axis=1, keepdims=True)

            # per-row max => fully stable (cheap: this slab occurs at most once per core)
            m_r = jnp.max(s_safe, axis=1, keepdims=True)
            lse_r = jnp.log(jnp.sum(jnp.exp(s_safe - m_r), axis=1, keepdims=True)) + m_r
            rl_ref[...] += jnp.where(rv1, lse_r, 0.0)
            dg_ref[...] += diag_rows

            m_old = m_ref[...]
            m_new = jnp.maximum(m_old, jnp.max(s_safe, axis=0, keepdims=True))
            l_ref[...] = l_ref[...] * jnp.exp(m_old - m_new) + jnp.sum(
                jnp.exp(s_safe - m_new), axis=0, keepdims=True)
            m_ref[...] = m_new

        if has_partial:
            is_full = row_start + tm <= n
            pl.when(is_full)(fast_path)
            pl.when(jnp.logical_not(is_full))(masked_path)
        else:
            fast_path()

    return kernel


def _vmem_budgets() -> tuple[int, int]:
    """Generation-aware (slab budget, vmem_limit) in bytes."""
    try:
        cap = int(pltpu.get_tpu_info().vmem_capacity_bytes)
    except Exception:
        cap = 64 * 1024 * 1024            # conservative: assume v7x-sized (64 MiB/TC) VMEM
    slab_budget = min(int(0.35 * cap), 40 * 1024 * 1024)   # ~22 MiB v7x, 40 MiB v5e/v6e
    vmem_limit = min(int(0.75 * cap), 96 * 1024 * 1024)    # 48 MiB v7x, 96 MiB v5e/v6e
    return slab_budget, vmem_limit


def _choose_tm(n: int, itemsize: int, slab_budget: int) -> int:
    """Row-slab height: live set = double-buffered native slab + ~3 f32 (TM,N) temporaries."""
    per_row = 2 * n * itemsize + 3 * n * 4
    tm = int(slab_budget // max(per_row, 1))
    tm = min(tm, 512)
    if tm >= n:
        return n
    align = max(8, 32 // max(itemsize, 1))       # 8 (f32), 16 (bf16), 32 (int8/fp8) packing
    if tm >= 128:
        return (tm // 128) * 128                 # 128-aligned -> aligned diag slice
    return max(align, (tm // align) * align)


def infonce_loss(similarity_matrix: jax.Array, tau: jax.Array, tm: int | None = None) -> jax.Array:
    """similarity_matrix: (N, N) square matrix (any float dtype); tau: scalar raw parameter."""
    assert similarity_matrix.ndim == 2
    assert similarity_matrix.shape[0] == similarity_matrix.shape[1]
    n = int(similarity_matrix.shape[0])
    itemsize = jnp.dtype(similarity_matrix.dtype).itemsize

    slab_budget, vmem_limit = _vmem_budgets()
    if tm is None:
        tm = _choose_tm(n, itemsize, slab_budget)
    tm = int(min(tm, n))

    tiles_total = -(-n // tm)
    nc = 2 if tiles_total >= 2 else 1            # split row slabs across 2 TCs on v7x
    tpc = -(-tiles_total // nc)                  # tiles per core (rectangular grid)
    has_partial = (tiles_total * tm != n) or (nc * tpc != tiles_total)
    if tm == n:
        diag_mode = "full"
    elif tm % 128 == 0:
        diag_mode = "slice"
    else:
        diag_mode = "compare"

    kernel = _make_kernel(n, tm, tpc, has_partial, diag_mode)
    tau2d = jnp.reshape(jnp.asarray(tau, dtype=jnp.float32), (1, 1))
    last_tile = tiles_total - 1

    in_specs = [
        pl.BlockSpec(memory_space=pltpu.SMEM),                 # tau (1,1) scalar
        # duplicated slabs (when nc*tpc > tiles_total) are clamped to the last real slab
        # and fully masked inside the kernel.
        pl.BlockSpec((tm, n), lambda c, i: (jnp.minimum(c * tpc + i, last_tile), 0)),
        # TODO(synk): pipeline_mode=pl.Buffered(3) here when the v7x budget forces a small TM.
    ]
    out_shape = (
        jax.ShapeDtypeStruct((nc, 1, n), jnp.float32),         # per-core column max
        jax.ShapeDtypeStruct((nc, 1, n), jnp.float32),         # per-core column sum-exp
        jax.ShapeDtypeStruct((nc, tm, 1), jnp.float32),        # per-core row-LSE partials
        jax.ShapeDtypeStruct((nc, tm, 1), jnp.float32),        # per-core diagonal partials
    )
    out_specs = (
        pl.BlockSpec((None, 1, n), lambda c, i: (c, 0, 0)),
        pl.BlockSpec((None, 1, n), lambda c, i: (c, 0, 0)),
        pl.BlockSpec((None, tm, 1), lambda c, i: (c, 0, 0)),
        pl.BlockSpec((None, tm, 1), lambda c, i: (c, 0, 0)),
    )

    m_out, l_out, rl_out, dg_out = pl.pallas_call(
        kernel,
        out_shape=out_shape,
        grid=(nc, tpc),
        in_specs=in_specs,
        out_specs=out_specs,
        compiler_params=pltpu.CompilerParams(
            dimension_semantics=("parallel", "arbitrary"),
            vmem_limit_bytes=vmem_limit,
        ),
        cost_estimate=pl.CostEstimate(
            flops=7 * n * n,
            transcendentals=n * n + 4 * n * tiles_total,
            bytes_accessed=n * n * itemsize + 16 * n,
        ),
    )(tau2d, similarity_matrix)

    # O(N) epilogue: merge the per-core online column-LSE stats and reduce the partials.
    m_all = m_out[:, 0, :]                                     # (NC, N)
    l_all = l_out[:, 0, :]
    m_g = jnp.max(m_all, axis=0)
    l_g = jnp.sum(l_all * jnp.exp(m_all - m_g), axis=0)
    col_lse_sum = jnp.sum(jnp.log(l_g) + m_g)
    row_lse_sum = jnp.sum(rl_out)
    diag_sum = jnp.sum(dg_out)
    return (0.5 * (row_lse_sum + col_lse_sum) - diag_sum) / n


def infonce_loss_ref(similarity_matrix: jax.Array, tau: jax.Array) -> jax.Array:
    """Pure-JAX reference (mirrors torch.nn.functional.cross_entropy on S and S.T)."""
    s = similarity_matrix.astype(jnp.float32) * jnp.asarray(tau, dtype=jnp.float32)
    diag = jnp.diagonal(s)
    loss1 = jnp.mean(jax.nn.logsumexp(s, axis=1) - diag)
    loss2 = jnp.mean(jax.nn.logsumexp(s, axis=0) - diag)
    return (loss1 + loss2) * 0.5


if __name__ == "__main__":
    # Deterministic parameter init, matching nn.Parameter(log(1/tau_init)).
    tau_init = 0.07
    tau = jnp.array(math.log(1.0 / tau_init), dtype=jnp.float32)

    k1, k2, k3, k4 = jax.random.split(jax.random.PRNGKey(0), 4)

    # 1) tiny single-slab path (tm == n).
    n1 = 8
    s1 = jax.random.normal(k1, (n1, n1), dtype=jnp.float32)
    out1 = jax.block_until_ready(infonce_loss(s1, tau))
    ref1 = infonce_loss_ref(s1, tau)
    assert jnp.allclose(out1, ref1, atol=1e-5, rtol=1e-5), (out1, ref1)

    # 2) multi-slab, 128-aligned diag slice, partial last slab + duplicated clamped slab,
    #    work split across the 2-core grid axis (3 tiles -> core0:{0,1}, core1:{2,dup}).
    n2 = 300
    s2 = jax.random.normal(k2, (n2, n2), dtype=jnp.float32)
    out2 = jax.block_until_ready(infonce_loss(s2, tau, tm=128))
    ref2 = infonce_loss_ref(s2, tau)
    assert jnp.allclose(out2, ref2, atol=1e-4, rtol=1e-4), (out2, ref2)

    # 3) small-TM fallback diag path + partial slab + duplicated slab.
    n3 = 40
    s3 = jax.random.normal(k3, (n3, n3), dtype=jnp.float32)
    out3 = jax.block_until_ready(infonce_loss(s3, tau, tm=16))
    ref3 = infonce_loss_ref(s3, tau)
    assert jnp.allclose(out3, ref3, atol=1e-4, rtol=1e-4), (out3, ref3)

    # 4) bf16 input streamed natively (halves HBM traffic on v5e/v6e), even 2-way split.
    n4 = 256
    s4 = jax.random.normal(k4, (n4, n4), dtype=jnp.float32).astype(jnp.bfloat16)
    out4 = jax.block_until_ready(infonce_loss(s4, tau, tm=128))
    ref4 = infonce_loss_ref(s4, tau)
    assert jnp.allclose(out4, ref4, atol=1e-4, rtol=1e-4), (out4, ref4)

    print("KERNEL_OK")
</pallas_src>

<mosaic_0001>
module attributes {stable_mosaic.version = 11 : i64} {
  func.func @kernel(%arg0: i32, %arg1: i32, %arg2: memref<1x1xf32, #tpu.memory_space<smem>>, %arg3: memref<8x8xf32, #tpu.memory_space<vmem>>, %arg4: memref<1x1x8xf32, #tpu.memory_space<vmem>>, %arg5: memref<1x1x8xf32, #tpu.memory_space<vmem>>, %arg6: memref<1x8x1xf32, #tpu.memory_space<vmem>>, %arg7: memref<1x8x1xf32, #tpu.memory_space<vmem>>) attributes {dimension_semantics = [#tpu.dimension_semantics<parallel>, #tpu.dimension_semantics<arbitrary>], iteration_bounds = array<i64: 1, 1>, scalar_prefetch = 0 : i64, scratch_operands = 0 : i64, tpu.core_type = #tpu.core_type<tc>, window_params = [{transform_indices = @transform_0, window_bounds = array<i64: 1, 1>}, {transform_indices = @transform_1, window_bounds = array<i64: 8, 8>}, {transform_indices = @transform_2, window_bounds = array<i64: 1, 1, 8>}, {transform_indices = @transform_3, window_bounds = array<i64: 1, 1, 8>}, {transform_indices = @transform_4, window_bounds = array<i64: 1, 8, 1>}, {transform_indices = @transform_5, window_bounds = array<i64: 1, 8, 1>}]} {
    %c0 = arith.constant 0 : index
    %c0_0 = arith.constant 0 : index
    %0 = memref.load %arg2[%c0, %c0_0] : memref<1x1xf32, #tpu.memory_space<smem>>
    %c0_i32 = arith.constant 0 : i32
    %1 = arith.cmpi eq, %arg1, %c0_i32 : i32
    %2 = arith.extui %1 : i1 to i32
    %c0_i32_1 = arith.constant 0 : i32
    %3 = arith.cmpi ne, %2, %c0_i32_1 : i32
    scf.if %3 {
      %cst_33 = arith.constant -1.000000e+30 : f32
      %60 = vector.broadcast %cst_33 : f32 to vector<1x8xf32>
      %c0_34 = arith.constant 0 : index
      %c0_35 = arith.constant 0 : index
      %c0_36 = arith.constant 0 : index
      %61 = vector.load %arg4[%c0_34, %c0_35, %c0_36] : memref<1x1x8xf32, #tpu.memory_space<vmem>>, vector<1x1x8xf32>
      %62 = vector.shape_cast %61 : vector<1x1x8xf32> to vector<1x8xf32>
      %63 = vector.shape_cast %60 : vector<1x8xf32> to vector<1x1x8xf32>
      tpu.vector_store %arg4[%c0_34, %c0_35, %c0_36], %63 {strides = array<i32>} : memref<1x1x8xf32, #tpu.memory_space<vmem>>, vector<1x1x8xf32>,
      %cst_37 = arith.constant 0.000000e+00 : f32
      %64 = vector.broadcast %cst_37 : f32 to vector<1x8xf32>
      %c0_38 = arith.constant 0 : index
      %c0_39 = arith.constant 0 : index
      %c0_40 = arith.constant 0 : index
      %65 = vector.load %arg5[%c0_38, %c0_39, %c0_40] : memref<1x1x8xf32, #tpu.memory_space<vmem>>, vector<1x1x8xf32>
      %66 = vector.shape_cast %65 : vector<1x1x8xf32> to vector<1x8xf32>
      %67 = vector.shape_cast %64 : vector<1x8xf32> to vector<1x1x8xf32>
      tpu.vector_store %arg5[%c0_38, %c0_39, %c0_40], %67 {strides = array<i32>} : memref<1x1x8xf32, #tpu.memory_space<vmem>>, vector<1x1x8xf32>,
      %cst_41 = arith.constant 0.000000e+00 : f32
      %68 = vector.broadcast %cst_41 : f32 to vector<8x1xf32>
      %c0_42 = arith.constant 0 : index
      %c0_43 = arith.constant 0 : index
      %c0_44 = arith.constant 0 : index
      %69 = vector.load %arg6[%c0_42, %c0_43, %c0_44] : memref<1x8x1xf32, #tpu.memory_space<vmem>>, vector<1x8x1xf32>
      %70 = vector.shape_cast %69 : vector<1x8x1xf32> to vector<8x1xf32>
      %71 = vector.shape_cast %68 : vector<8x1xf32> to vector<1x8x1xf32>
      tpu.vector_store %arg6[%c0_42, %c0_43, %c0_44], %71 {strides = array<i32>} : memref<1x8x1xf32, #tpu.memory_space<vmem>>, vector<1x8x1xf32>,
      %cst_45 = arith.constant 0.000000e+00 : f32
      %72 = vector.broadcast %cst_45 : f32 to vector<8x1xf32>
      %c0_46 = arith.constant 0 : index
      %c0_47 = arith.constant 0 : index
      %c0_48 = arith.constant 0 : index
      %73 = vector.load %arg7[%c0_46, %c0_47, %c0_48] : memref<1x8x1xf32, #tpu.memory_space<vmem>>, vector<1x8x1xf32>
      %74 = vector.shape_cast %73 : vector<1x8x1xf32> to vector<8x1xf32>
      %75 = vector.shape_cast %72 : vector<8x1xf32> to vector<1x8x1xf32>
      tpu.vector_store %arg7[%c0_46, %c0_47, %c0_48], %75 {strides = array<i32>} : memref<1x8x1xf32, #tpu.memory_space<vmem>>, vector<1x8x1xf32>,
    } else {
    }
    %c0_2 = arith.constant 0 : index
    %c0_3 = arith.constant 0 : index
    %4 = vector.load %arg3[%c0_2, %c0_3] : memref<8x8xf32, #tpu.memory_space<vmem>>, vector<8x8xf32>
    %5 = vector.broadcast %0 : f32 to vector<8x8xf32>
    %6 = arith.mulf %4, %5 : vector<8x8xf32>
    %7 = tpu.iota {dimensions = array<i32: 0>} : vector<8x8xi32>
    %8 = tpu.iota {dimensions = array<i32: 1>} : vector<8x8xi32>
    %9 = arith.cmpi eq, %7, %8 : vector<8x8xi32>
    %cst = arith.constant 0.000000e+00 : f32
    %10 = vector.broadcast %cst : f32 to vector<8x8xf32>
    %11 = arith.select %9, %6, %10 : vector<8x8xi1>, vector<8x8xf32>
    %cst_4 = arith.constant dense<0.000000e+00> : vector<8xf32>
    %12 = vector.multi_reduction <add>, %11, %cst_4 [1] : vector<8x8xf32> to vector<8xf32>
    %13 = vector.shape_cast %12 : vector<8xf32> to vector<8x1xf32>
    %c0_5 = arith.constant 0 : index
    %c0_6 = arith.constant 0 : index
    %c0_7 = arith.constant 0 : index
    %14 = vector.load %arg4[%c0_5, %c0_6, %c0_7] : memref<1x1x8xf32, #tpu.memory_space<vmem>>, vector<1x1x8xf32>
    %15 = vector.shape_cast %14 : vector<1x1x8xf32> to vector<1x8xf32>
    %cst_8 = arith.constant dense<0xFF800000> : vector<8xf32>
    %16 = vector.multi_reduction <maximumf>, %6, %cst_8 [0] : vector<8x8xf32> to vector<8xf32>
    %17 = vector.shape_cast %16 : vector<8xf32> to vector<1x8xf32>
    %18 = arith.maximumf %15, %17 : vector<1x8xf32>
    %19 = vector.broadcast %18 : vector<1x8xf32> to vector<8x8xf32>
    %20 = arith.subf %6, %19 : vector<8x8xf32>
    %21 = math.exp %20 : vector<8x8xf32>
    %c0_9 = arith.constant 0 : index
    %c0_10 = arith.constant 0 : index
    %c0_11 = arith.constant 0 : index
    %22 = vector.load %arg5[%c0_9, %c0_10, %c0_11] : memref<1x1x8xf32, #tpu.memory_space<vmem>>, vector<1x1x8xf32>
    %23 = vector.shape_cast %22 : vector<1x1x8xf32> to vector<1x8xf32>
    %24 = arith.subf %15, %18 : vector<1x8xf32>
    %25 = math.exp %24 : vector<1x8xf32>
    %26 = arith.mulf %23, %25 : vector<1x8xf32>
    %cst_12 = arith.constant dense<0.000000e+00> : vector<8xf32>
    %27 = vector.multi_reduction <add>, %21, %cst_12 [0] : vector<8x8xf32> to vector<8xf32>
    %28 = vector.shape_cast %27 : vector<8xf32> to vector<1x8xf32>
    %29 = arith.addf %26, %28 : vector<1x8xf32>
    %c0_13 = arith.constant 0 : index
    %c0_14 = arith.constant 0 : index
    %c0_15 = arith.constant 0 : index
    %30 = vector.load %arg5[%c0_13, %c0_14, %c0_15] : memref<1x1x8xf32, #tpu.memory_space<vmem>>, vector<1x1x8xf32>
    %31 = vector.shape_cast %30 : vector<1x1x8xf32> to vector<1x8xf32>
    %32 = vector.shape_cast %29 : vector<1x8xf32> to vector<1x1x8xf32>
    tpu.vector_store %arg5[%c0_13, %c0_14, %c0_15], %32 {strides = array<i32>} : memref<1x1x8xf32, #tpu.memory_space<vmem>>, vector<1x1x8xf32>,
    %c0_16 = arith.constant 0 : index
    %c0_17 = arith.constant 0 : index
    %c0_18 = arith.constant 0 : index
    %33 = vector.load %arg4[%c0_16, %c0_17, %c0_18] : memref<1x1x8xf32, #tpu.memory_space<vmem>>, vector<1x1x8xf32>
    %34 = vector.shape_cast %33 : vector<1x1x8xf32> to vector<1x8xf32>
    %35 = vector.shape_cast %18 : vector<1x8xf32> to vector<1x1x8xf32>
    tpu.vector_store %arg4[%c0_16, %c0_17, %c0_18], %35 {strides = array<i32>} : memref<1x1x8xf32, #tpu.memory_space<vmem>>, vector<1x1x8xf32>,
    %cst_19 = arith.constant dense<0xFF800000> : vector<1xf32>
    %36 = vector.multi_reduction <maximumf>, %18, %cst_19 [1] : vector<1x8xf32> to vector<1xf32>
    %37 = vector.shape_cast %36 : vector<1xf32> to vector<1x1xf32>
    %38 = vector.broadcast %37 : vector<1x1xf32> to vector<1x8xf32>
    %39 = arith.subf %18, %38 : vector<1x8xf32>
    %40 = math.exp %39 : vector<1x8xf32>
    %41 = vector.broadcast %40 : vector<1x8xf32> to vector<8x8xf32>
    %42 = arith.mulf %21, %41 : vector<8x8xf32>
    %cst_20 = arith.constant dense<0.000000e+00> : vector<8xf32>
    %43 = vector.multi_reduction <add>, %42, %cst_20 [1] : vector<8x8xf32> to vector<8xf32>
    %44 = vector.shape_cast %43 : vector<8xf32> to vector<8x1xf32>
    %c0_21 = arith.constant 0 : index
    %c0_22 = arith.constant 0 : index
    %c0_23 = arith.constant 0 : index
    %45 = vector.load %arg6[%c0_21, %c0_22, %c0_23] : memref<1x8x1xf32, #tpu.memory_space<vmem>>, vector<1x8x1xf32>
    %46 = vector.shape_cast %45 : vector<1x8x1xf32> to vector<8x1xf32>
    %47 = math.log %44 : vector<8x1xf32>
    %48 = vector.broadcast %37 : vector<1x1xf32> to vector<8x1xf32>
    %49 = arith.addf %47, %48 : vector<8x1xf32>
    %50 = arith.addf %46, %49 : vector<8x1xf32>
    %c0_24 = arith.constant 0 : index
    %c0_25 = arith.constant 0 : index
    %c0_26 = arith.constant 0 : index
    %51 = vector.load %arg6[%c0_24, %c0_25, %c0_26] : memref<1x8x1xf32, #tpu.memory_space<vmem>>, vector<1x8x1xf32>
    %52 = vector.shape_cast %51 : vector<1x8x1xf32> to vector<8x1xf32>
    %53 = vector.shape_cast %50 : vector<8x1xf32> to vector<1x8x1xf32>
    tpu.vector_store %arg6[%c0_24, %c0_25, %c0_26], %53 {strides = array<i32>} : memref<1x8x1xf32, #tpu.memory_space<vmem>>, vector<1x8x1xf32>,
    %c0_27 = arith.constant 0 : index
    %c0_28 = arith.constant 0 : index
    %c0_29 = arith.constant 0 : index
    %54 = vector.load %arg7[%c0_27, %c0_28, %c0_29] : memref<1x8x1xf32, #tpu.memory_space<vmem>>, vector<1x8x1xf32>
    %55 = vector.shape_cast %54 : vector<1x8x1xf32> to vector<8x1xf32>
    %56 = arith.addf %55, %13 : vector<8x1xf32>
    %c0_30 = arith.constant 0 : index
    %c0_31 = arith.constant 0 : index
    %c0_32 = arith.constant 0 : index
    %57 = vector.load %arg7[%c0_30, %c0_31, %c0_32] : memref<1x8x1xf32, #tpu.memory_space<vmem>>, vector<1x8x1xf32>
    %58 = vector.shape_cast %57 : vector<1x8x1xf32> to vector<8x1xf32>
    %59 = vector.shape_cast %56 : vector<8x1xf32> to vector<1x8x1xf32>
    tpu.vector_store %arg7[%c0_30, %c0_31, %c0_32], %59 {strides = array<i32>} : memref<1x8x1xf32, #tpu.memory_space<vmem>>, vector<1x8x1xf32>,
    return
  }
  func.func @transform_0(%arg0: i32, %arg1: i32) -> (i32, i32) {
    %c0_i32 = arith.constant 0 : i32
    %c0_i32_0 = arith.constant 0 : i32
    %c0_i32_1 = arith.constant 0 : i32
    return %c0_i32, %c0_i32_0 : i32, i32
  }
  func.func @transform_1(%arg0: i32, %arg1: i32) -> (i32, i32) {
    %c1_i32 = arith.constant 1 : i32
    %0 = arith.muli %arg0, %c1_i32 : i32
    %1 = arith.addi %0, %arg1 : i32
    %c0_i32 = arith.constant 0 : i32
    %2 = arith.minsi %1, %c0_i32 : i32
    %c0_i32_0 = arith.constant 0 : i32
    %c0_i32_1 = arith.constant 0 : i32
    return %2, %c0_i32_0 : i32, i32
  }
  func.func @transform_2(%arg0: i32, %arg1: i32) -> (i32, i32, i32) {
    %c0_i32 = arith.constant 0 : i32
    %c0_i32_0 = arith.constant 0 : i32
    %c0_i32_1 = arith.constant 0 : i32
    return %arg0, %c0_i32, %c0_i32_0 : i32, i32, i32
  }
  func.func @transform_3(%arg0: i32, %arg1: i32) -> (i32, i32, i32) {
    %c0_i32 = arith.constant 0 : i32
    %c0_i32_0 = arith.constant 0 : i32
    %c0_i32_1 = arith.constant 0 : i32
    return %arg0, %c0_i32, %c0_i32_0 : i32, i32, i32
  }
  func.func @transform_4(%arg0: i32, %arg1: i32) -> (i32, i32, i32) {
    %c0_i32 = arith.constant 0 : i32
    %c0_i32_0 = arith.constant 0 : i32
    %c0_i32_1 = arith.constant 0 : i32
    return %arg0, %c0_i32, %c0_i32_0 : i32, i32, i32
  }
  func.func @transform_5(%arg0: i32, %arg1: i32) -> (i32, i32, i32) {
    %c0_i32 = arith.constant 0 : i32
    %c0_i32_0 = arith.constant 0 : i32
    %c0_i32_1 = arith.constant 0 : i32
    return %arg0, %c0_i32, %c0_i32_0 : i32, i32, i32
  }
}

</mosaic_0001>

<bundles_post_ra>
// kernel: tpu_custom_call.1
= control target key start
LH: loop header
LB: loop body
LE: loop exit
PB: predicated region body
PF: predicated region fallthrough
CT: control target
= control target key end

     0   :  { %12 = vsyncpa [#allocation4], 0  ;;  %s331_s0 = inlined_call_operand.<no memory space> [shape: f32[1,1], index: 0, kind: input, shape index: {}]   ;;  %s332_s1 = inlined_call_operand.hbm [shape: f32[8,8], index: 1, kind: input, shape index: {}]   ;;  %s333_s2 = inlined_call_operand.hbm [shape: f32[1,1,8], index: 2, kind: output, shape index: {0}]   ;;  %s334_s3 = inlined_call_operand.hbm [shape: f32[1,1,8], index: 3, kind: output, shape index: {1}]   ;;  %s335_s4 = inlined_call_operand.vmem [shape: f32[1,8,1], index: 4, kind: output, shape index: {2}]   ;;  %s336_s5 = inlined_call_operand.vmem [shape: f32[1,8,1], index: 5, kind: output, shape index: {3}]  }
   0x1   :  { %13 = vsyncpa [#allocation5], 0 }
   0x2   :  { %14 = vsyncpa [#allocation8], 0  ;;  %s27_s20 = sshll.u32 %s332_s1, 4  ;;  %s253_s21 = smov [#allocation3]   ;;  %s28_s20 = int_to_ptr.hbm [resolvable:$true] %s27_s20 }
   0x3   :  { %s29_s22 = sshll.u32 %s253_s21, 4  ;;  %s30_s22 = int_to_ptr.vmem [resolvable:$true] %s29_s22 }
   0x4   :  { %32 = dma.hbm_to_vmem [thread:$0]  %s28_s20, 128, %s30_s22, [#allocation4]  }
   0x5   :  { %247 = dma.done.wait [#allocation4], 128  }
   0x6   :  { %248 = vsyncadd [#allocation4], 4294967168  ;;  %vm45_vm0 = vcmask 57344   ;;  %v254_v0 = vmov -1e+30   ;;  %v52_v1 = vstv %s331_s0  ;;  %v51_v2 = vld [vmem:[#allocation3] sm:$0xff]  ;;  %v54_v14 = vlaneseq }
   0x7   :  { %46 = vst.msk [vmem:[#allocation6] sm:$0x1] %vm45_vm0, %v254_v0  ;;  %vm60_vm1 = vcmask 64512   ;;  %v53_v3 = vmul.f32 %v52_v1, %v51_v2  ;;  %vm48_vm2 = vcmask 7168   ;;  %v255_v15 = vmov 0.0   ;;  %s256_s27 = smov [#allocation6]  }
   0x8   :  { %49 = vst.msk [vmem:[%s335_s4] sm:$0xff] %vm48_vm2, %v255_v15  ;;  %v55_v16 = vshrl.u32 %v54_v14, 7  ;;  %v57_v17 = vand.u32 127, %v54_v14  ;;  %s124_s28 = sshll.u32 %s256_s27, 4  ;;  %s126_s6 = sshll.u32 %s333_s2, 4  ;;  %s125_s28 = int_to_ptr.vmem [resolvable:$true] %s124_s28  ;;  %s127_s6 = int_to_ptr.hbm [resolvable:$true] %s126_s6 }
   0x9   :  { %v65_v4 = vsel %vm60_vm1, %v53_v3, -inf  ;;  %47 = vst.msk [vmem:[#allocation7] sm:$0x1] %vm45_vm0, %v255_v15  ;;  %s257_s7 = smov [#allocation7]   ;;  %s137_s10 = sshll.u32 %s334_s3, 4  ;;  %s138_s10 = int_to_ptr.hbm [resolvable:$true] %s137_s10 }
   0xa   :  { %v66_v5 = vrot.slane %v65_v4, 4  ;;  %50 = vst.msk [vmem:[%s336_s5] sm:$0xff] %vm48_vm2, %v255_v15  ;;  %vm58_vm3 = vcmp.eq.s32.totalorder %v55_v16, %v57_v17  ;;  %s135_s8 = sshll.u32 %s257_s7, 4  ;;  %s136_s8 = int_to_ptr.vmem [resolvable:$true] %s135_s8 }
   0xb   :  { %v59_v18 = vsel %vm58_vm3, %v53_v3, 0.0 }
   0xc   :  { %v67_v6 = vmax.f32 %v65_v4, %v66_v5  ;;  %v61_v19 = vsel %vm60_vm1, %v59_v18, 0.0 }
   0xd   :  { %62 = vadd.xlane.f32.xlu1 %v61_v19 }
   0xe   :  { %v68_v7 = vrot.slane %v67_v6, 2  ;;  %v64_v10 = vld [vmem:[#allocation6] sm:$0x1] }
   0xf   :  { %v108_v51 = vld [vmem:[%s335_s4] sm:$0xff] }
  0x10   :  { %v69_v8 = vmax.f32 %v67_v6, %v68_v7  ;;  %v79_v40 = vld [vmem:[#allocation7] sm:$0x1] }
  0x11   :  { %v116_v44 = vld [vmem:[%s336_s5] sm:$0xff] }
  0x12   :  { %v70_v9 = vrot.slane %v69_v8, 1 }
  0x14   :  { %v71_v11 = vmax.f32 %v69_v8, %v70_v9 }
  0x16   :  { %v72_v12 = vmax.f32 %v64_v10, %v71_v11 }
  0x18   :  { %v95_v13 = vsel %vm45_vm0, %v72_v12, -inf  ;;  %94 = vst.msk [vmem:[#allocation6] sm:$0x1] %vm45_vm0, %v72_v12  ;;  %v74_v20 = vperm.slane %v72_v12, 0  ;;  %v80_v32 = vsub.f32 %v64_v10, %v72_v12 }
  0x19   :  { %96 = vmax.xlane.f32.xlu0 %v95_v13  ;;  %129 = dma.vmem_to_hbm [thread:$0]  %s125_s28, 16, %s127_s6, [#allocation5]  }
  0x1a   :  { %v76_v21 = vsub.f32 %v53_v3, %v74_v20  ;;  %v81_v34 = vmul.f32 1.442695, %v80_v32 }
  0x1c   :  { %v77_v23 = vmul.f32 1.442695, %v76_v21 }
  0x1e   :  { %167 = vpow2.f32 %v77_v23 }
  0x24   :  { %v168_v26 = vpop.eup %167 }
  0x25   :  { %v84_v31 = vsel %vm60_vm1, %v168_v26, 0.0 }
  0x26   :  { %v85_v33 = vrot.slane %v84_v31, 4 }
  0x28   :  { %v86_v35 = vadd.f32 %v85_v33, %v84_v31 }
  0x2a   :  { %v87_v36 = vrot.slane %v86_v35, 2 }
  0x2c   :  { %v88_v37 = vadd.f32 %v87_v36, %v86_v35 }
  0x2e   :  { %v89_v38 = vrot.slane %v88_v37, 1 }
  0x30   :  { %v90_v42 = vadd.f32 %v89_v38, %v88_v37 }
  0x80   :  { %v63_v43 = vpop.xlane.xlu1 %62 }
  0x81   :  { %v117_v46 = vadd.f32 %v116_v44, %v63_v43 }
  0x83   :  { %118 = vst.msk [vmem:[%s336_s5] sm:$0xff] %vm48_vm2, %v117_v46 }
  0x8c   :  { %v97_v22 = vpop.xlane.xlu0 %96 }
  0x8d   :  { %v98_v24 = vsub.f32 %v72_v12, %v97_v22  ;;  %v111_v49 = vperm.slane %v97_v22, 0 }
  0x8f   :  { %v99_v25 = vmul.f32 1.442695, %v98_v24 }
  0x91   :  { %169 = vpow2.f32 %v99_v25 }
  0x92   :  { %171 = vpow2.f32 %v81_v34 }
  0x97   :  { %v170_v27 = vpop.eup %169 }
  0x98   :  { %v102_v28 = vperm.slane %v170_v27, 0  ;;  %v172_v39 = vpop.eup %171 }
  0x99   :  { %v83_v41 = vmul.f32 %v172_v39, %v79_v40 }
  0x9a   :  { %v104_v29 = vmul.f32 %v168_v26, %v102_v28 }
  0x9b   :  { %v91_v45 = vadd.f32 %v90_v42, %v83_v41 }
  0x9c   :  { %v105_v30 = vsel %vm60_vm1, %v104_v29, 0.0 }
  0x9d   :  { %106 = vadd.xlane.f32.xlu0 %v105_v30  ;;  %93 = vst.msk [vmem:[#allocation7] sm:$0x1] %vm45_vm0, %v91_v45 }
  0x9e   :  { %140 = dma.vmem_to_hbm [thread:$0]  %s136_s8, 16, %s138_s10, [#allocation8]  }
 0x110   :  { %v107_v47 = vpop.xlane.xlu0 %106 }
 0x111   :  { %173 = vlog2.f32 %v107_v47 }
 0x117   :  { %v174_v48 = vpop.eup %173 }
 0x118   :  { %v110_v50 = vmul.f32 0.6931472, %v174_v48 }
 0x11a   :  { %v112_v52 = vadd.f32 %v111_v49, %v110_v50 }
 0x11c   :  { %v113_v53 = vadd.f32 %v112_v52, %v108_v51 }
 0x11e   :  { %115 = vst.msk [vmem:[%s335_s4] sm:$0xff] %vm48_vm2, %v113_v53 }
 0x11f   :  { %249 = dma.done.wait [#allocation5], 16  }
 0x120   :  { %250 = vsyncadd [#allocation5], 4294967280 }
 0x121   :  { %251 = dma.done.wait [#allocation8], 16  }
 0x122   :  { %252 = vsyncadd [#allocation8], 4294967280 }
 0x123   :  { %157 = vsyncpa [#allocation4], 1 }
 0x124   :  { %158 = vsyncpa [#allocation5], 1 }
 0x125   :  { %159 = vsyncpa [#allocation8], 1 }

</bundles_post_ra>
